<compile_context>
chip_gen: v7x
topology: tpu7x:2x2x1
jax: 0.10.0
libtpu: 0.0.40
codegen_flags: <defaults>
</compile_context>

<pallas_src>
import functools

import jax
import jax.numpy as jnp
import numpy as np
from jax.experimental import pallas as pl
from jax.experimental.pallas import tpu as pltpu


def _round_up(x, m):
    return (x + m - 1) // m * m


def _sablock_kernel(x_ref, w_ref, o_ref, *, H, W, Cout_p):
    # x_ref: (Nb, Cin, H*W)        input images, channels-first, spatial flat
    # w_ref: (2*Cout_p, 9*Cin)     fused [attention; conv] tap weights (bf16)
    # o_ref: (Nb, Cout, H*W)
    Nb, Cin, HW = x_ref.shape
    Cout = o_ref.shape[1]

    # Border-validity masks: channel-independent, computed once per grid step
    # on a (1, HW) slab and broadcast at the select (saves VALU work and mask
    # vreg footprint vs. building them at (Cin, HW)).
    pos = jax.lax.broadcasted_iota(jnp.int32, (1, HW), 1)
    col = pos % W
    row_ok = {0: pos >= W, 1: None, 2: pos < (H - 1) * W}    # kh = 0 / 1 / 2
    col_ok = {0: col >= 1, 1: None, 2: col <= W - 2}         # kw = 0 / 1 / 2

    w = w_ref[...]                                  # (2*Cout_p, 9*Cin), resident

    for b in range(Nb):                             # Nb is small and static
        x = x_ref[b]                                # (Cin, HW) f32
        slabs = []
        for kh in range(3):
            for kw in range(3):
                d = (kh - 1) * W + (kw - 1)         # flattened source offset
                if d == 0:
                    slabs.append(x)                 # centre tap: no shift/mask
                    continue
                shifted = pltpu.roll(x, shift=(-d) % HW, axis=1)
                mask = None
                for m in (row_ok[kh], col_ok[kw]):
                    if m is not None:
                        mask = m if mask is None else (mask & m)
                slabs.append(jnp.where(mask, shifted, jnp.zeros_like(shifted)))

        # Stack the taps along the contraction axis and cast ONCE to bf16
        # (MXU-native operand dtype on all three generations; all the VPU
        # work above stayed f32).
        patch = jnp.concatenate(slabs, axis=0).astype(jnp.bfloat16)  # (9*Cin, HW)

        # ONE fused matmul for both branches and all 9 taps: K = 9*Cin,
        # f32 accumulation.
        acc = jnp.dot(w, patch, preferred_element_type=jnp.float32)

        att = jax.nn.sigmoid(acc[:Cout_p])          # attention branch (f32)
        out = acc[Cout_p:] * att                    # feature branch * mask
        o_ref[b] = out[:Cout].astype(o_ref.dtype)


def _pick_batch_block(N, in_bytes_per_img, out_bytes_per_img,
                      vmem_budget=8 << 20):
    """Images per grid step: keep >= 2 grid steps when N >= 2 (so both v7x
    TensorCores get work), and otherwise pick the fattest step the VMEM
    budget allows to amortize per-step overhead."""
    per_img = 2 * (in_bytes_per_img + out_bytes_per_img)   # double-buffered
    cap = max(1, int(vmem_budget // max(per_img, 1)))
    best = 1
    for nb in range(1, min(N, cap) + 1):
        if N % nb == 0 and (N // nb >= 2 or N < 2):
            best = nb
    return best


def sablock_pallas(x_nchw, w_att_oihw, w_conv_oihw):
    """x_nchw: (N, Cin, H, W). Weights in PyTorch OIHW layout (Cout, Cin, 3, 3).
    Returns (N, Cout, H, W), matching SABlock.forward."""
    N, Cin, H, W = x_nchw.shape
    Cout = w_att_oihw.shape[0]
    HW = H * W
    Cout_p = _round_up(Cout, 8)          # sublane-align each branch's slab

    # Free reshape -- no transpose, no pad, no extra HBM pass over x.
    x_flat = x_nchw.reshape(N, Cin, HW)

    # Fuse both branches + all 9 taps into a single (2*Cout_p, 9*Cin) LHS.
    # Rows [0, Cout_p): attention branch; rows [Cout_p, 2*Cout_p): feature
    # branch (zero rows pad Cout up to a multiple of 8).  Column order
    # (kh, kw, cin) matches the in-kernel patch stack.
    def _taps(w_oihw):
        w = jnp.transpose(w_oihw, (0, 2, 3, 1)).reshape(Cout, 9 * Cin)
        return jnp.pad(w, ((0, Cout_p - Cout), (0, 0)))

    w_fused = jnp.concatenate([_taps(w_att_oihw), _taps(w_conv_oihw)],
                              axis=0).astype(jnp.bfloat16)

    nb = _pick_batch_block(
        N,
        in_bytes_per_img=Cin * HW * x_flat.dtype.itemsize,
        out_bytes_per_img=Cout * HW * x_flat.dtype.itemsize,
    )

    # TODO(synk): for large images (Cin*H*W beyond a few MiB per image) add
    # row-strip spatial tiling with a 1-row halo so blocks fit v7x's 64 MiB
    # VMEM and the strip axis can be marked "parallel" even when N == 1.
    out_flat = pl.pallas_call(
        functools.partial(_sablock_kernel, H=H, W=W, Cout_p=Cout_p),
        out_shape=jax.ShapeDtypeStruct((N, Cout, HW), x_nchw.dtype),
        grid_spec=pltpu.PrefetchScalarGridSpec(
            num_scalar_prefetch=0,
            grid=(N // nb,),
            in_specs=[
                pl.BlockSpec((nb, Cin, HW), lambda b: (b, 0, 0)),
                # Constant index_map: the weight slab stays VMEM-resident.
                pl.BlockSpec((2 * Cout_p, 9 * Cin), lambda b: (0, 0)),
            ],
            out_specs=pl.BlockSpec((nb, Cout, HW), lambda b: (b, 0, 0)),
        ),
        compiler_params=pltpu.CompilerParams(
            dimension_semantics=("parallel",),
            # Explicit scoped-VMEM budget: safe on v5e/v6e/v7x, above v5e's
            # 16 MiB scoped default; blocks at these shapes fit trivially.
            vmem_limit_bytes=32 << 20,
        ),
    )(x_flat, w_fused)

    # Free reshape back to NCHW (just splits the trailing dim).
    return out_flat.reshape(N, Cout, H, W)


def _reference(x_nchw, w_att_oihw, w_conv_oihw):
    """Pure-JAX reference using lax.conv (NCHW / OIHW, padding=1)."""
    dn = jax.lax.conv_dimension_numbers(
        x_nchw.shape, w_att_oihw.shape, ("NCHW", "OIHW", "NCHW"))
    att = jax.lax.conv_general_dilated(
        x_nchw, w_att_oihw, (1, 1), ((1, 1), (1, 1)), dimension_numbers=dn)
    feat = jax.lax.conv_general_dilated(
        x_nchw, w_conv_oihw, (1, 1), ((1, 1), (1, 1)), dimension_numbers=dn)
    return feat * jax.nn.sigmoid(att)


if __name__ == "__main__":
    # Small shapes consistent with the module.
    N, Cin, Cout, H, W = 2, 4, 8, 16, 16

    key = jax.random.PRNGKey(0)
    kx, ka, kc = jax.random.split(key, 3)
    x = jax.random.normal(kx, (N, Cin, H, W), dtype=jnp.float32)
    # Deterministic synthetic conv weights (PyTorch OIHW shape: Cout,Cin,3,3).
    w_att = jax.random.normal(ka, (Cout, Cin, 3, 3), dtype=jnp.float32) * 0.1
    w_conv = jax.random.normal(kc, (Cout, Cin, 3, 3), dtype=jnp.float32) * 0.1

    out = jax.block_until_ready(sablock_pallas(x, w_att, w_conv))
    ref = jax.block_until_ready(_reference(x, w_att, w_conv))

    assert out.shape == (N, Cout, H, W)
    # Matmul operands are deliberately bf16 (MXU-native on v5e/v6e/v7x) with
    # f32 accumulation; tolerance reflects bf16 operand rounding.
    np.testing.assert_allclose(np.asarray(out), np.asarray(ref),
                               rtol=2e-2, atol=2e-2)

    print("KERNEL_OK")
</pallas_src>

<mosaic_0001>
module attributes {stable_mosaic.version = 11 : i64} {
  func.func @_sablock_kernel(%arg0: i32, %arg1: memref<1x4x256xf32, #tpu.memory_space<vmem>>, %arg2: memref<16x36xbf16, #tpu.memory_space<vmem>>, %arg3: memref<1x8x256xf32, #tpu.memory_space<vmem>>) attributes {dimension_semantics = [#tpu.dimension_semantics<parallel>], iteration_bounds = array<i64: 2>, scalar_prefetch = 0 : i64, scratch_operands = 0 : i64, tpu.core_type = #tpu.core_type<tc>, window_params = [{transform_indices = @transform_0, window_bounds = array<i64: 1, 4, 256>}, {pipeline_mode = #tpu.pipeline_mode<synchronous>, transform_indices = @transform_1, window_bounds = array<i64: 16, 36>}, {transform_indices = @transform_2, window_bounds = array<i64: 1, 8, 256>}]} {
    %0 = tpu.iota {dimensions = array<i32: 1>} : vector<1x256xi32>
    %c16_i32 = arith.constant 16 : i32
    %c0_i32 = arith.constant 0 : i32
    %1 = arith.cmpi eq, %c16_i32, %c0_i32 : i32
    %c1_i32 = arith.constant 1 : i32
    %2 = arith.select %1, %c1_i32, %c16_i32 : i32
    %3 = vector.broadcast %2 : i32 to vector<1x256xi32>
    %4 = arith.remsi %0, %3 : vector<1x256xi32>
    %c0_i32_0 = arith.constant 0 : i32
    %5 = vector.broadcast %c0_i32_0 : i32 to vector<1x256xi32>
    %6 = arith.cmpi ne, %4, %5 : vector<1x256xi32>
    %c0_i32_1 = arith.constant 0 : i32
    %7 = vector.broadcast %c0_i32_1 : i32 to vector<1x256xi32>
    %8 = arith.cmpi slt, %4, %7 : vector<1x256xi32>
    %c0_i32_2 = arith.constant 0 : i32
    %9 = arith.cmpi slt, %2, %c0_i32_2 : i32
    %10 = vector.broadcast %9 : i1 to vector<1x256xi1>
    %11 = vector.broadcast %10 : vector<1x256xi1> to vector<1x256xi1>
    %12 = arith.xori %8, %11 : vector<1x256xi1>
    %13 = arith.andi %12, %6 : vector<1x256xi1>
    %14 = vector.broadcast %2 : i32 to vector<1x256xi32>
    %15 = arith.addi %4, %14 : vector<1x256xi32>
    %16 = arith.select %13, %15, %4 : vector<1x256xi1>, vector<1x256xi32>
    %c16_i32_3 = arith.constant 16 : i32
    %17 = vector.broadcast %c16_i32_3 : i32 to vector<1x256xi32>
    %18 = arith.cmpi sge, %0, %17 : vector<1x256xi32>
    %c240_i32 = arith.constant 240 : i32
    %19 = vector.broadcast %c240_i32 : i32 to vector<1x256xi32>
    %20 = arith.cmpi slt, %0, %19 : vector<1x256xi32>
    %c1_i32_4 = arith.constant 1 : i32
    %21 = vector.broadcast %c1_i32_4 : i32 to vector<1x256xi32>
    %22 = arith.cmpi sge, %16, %21 : vector<1x256xi32>
    %c14_i32 = arith.constant 14 : i32
    %23 = vector.broadcast %c14_i32 : i32 to vector<1x256xi32>
    %24 = arith.cmpi sle, %16, %23 : vector<1x256xi32>
    %c0 = arith.constant 0 : index
    %c0_5 = arith.constant 0 : index
    %25 = vector.load %arg2[%c0, %c0_5] : memref<16x36xbf16, #tpu.memory_space<vmem>>, vector<16x36xbf16>
    %c0_6 = arith.constant 0 : index
    %c0_7 = arith.constant 0 : index
    %c0_8 = arith.constant 0 : index
    %26 = vector.load %arg1[%c0_6, %c0_7, %c0_8] : memref<1x4x256xf32, #tpu.memory_space<vmem>>, vector<1x4x256xf32>
    %27 = vector.shape_cast %26 : vector<1x4x256xf32> to vector<4x256xf32>
    %c17_i32 = arith.constant 17 : i32
    %28 = tpu.dynamic_rotate %27 by %c17_i32 dim 1 : vector<4x256xf32>, i32 -> vector<4x256xf32>
    %29 = arith.andi %18, %22 : vector<1x256xi1>
    %cst = arith.constant 0.000000e+00 : f32
    %30 = vector.broadcast %cst : f32 to vector<4x256xf32>
    %31 = vector.shape_cast %29 : vector<1x256xi1> to vector<1x256xi1>
    %32 = vector.broadcast %31 : vector<1x256xi1> to vector<4x256xi1>
    %33 = arith.select %32, %28, %30 : vector<4x256xi1>, vector<4x256xf32>
    %c16_i32_9 = arith.constant 16 : i32
    %34 = tpu.dynamic_rotate %27 by %c16_i32_9 dim 1 : vector<4x256xf32>, i32 -> vector<4x256xf32>
    %cst_10 = arith.constant 0.000000e+00 : f32
    %35 = vector.broadcast %cst_10 : f32 to vector<4x256xf32>
    %36 = vector.shape_cast %18 : vector<1x256xi1> to vector<1x256xi1>
    %37 = vector.broadcast %36 : vector<1x256xi1> to vector<4x256xi1>
    %38 = arith.select %37, %34, %35 : vector<4x256xi1>, vector<4x256xf32>
    %c15_i32 = arith.constant 15 : i32
    %39 = tpu.dynamic_rotate %27 by %c15_i32 dim 1 : vector<4x256xf32>, i32 -> vector<4x256xf32>
    %40 = arith.andi %18, %24 : vector<1x256xi1>
    %cst_11 = arith.constant 0.000000e+00 : f32
    %41 = vector.broadcast %cst_11 : f32 to vector<4x256xf32>
    %42 = vector.shape_cast %40 : vector<1x256xi1> to vector<1x256xi1>
    %43 = vector.broadcast %42 : vector<1x256xi1> to vector<4x256xi1>
    %44 = arith.select %43, %39, %41 : vector<4x256xi1>, vector<4x256xf32>
    %c1_i32_12 = arith.constant 1 : i32
    %45 = tpu.dynamic_rotate %27 by %c1_i32_12 dim 1 : vector<4x256xf32>, i32 -> vector<4x256xf32>
    %cst_13 = arith.constant 0.000000e+00 : f32
    %46 = vector.broadcast %cst_13 : f32 to vector<4x256xf32>
    %47 = vector.shape_cast %22 : vector<1x256xi1> to vector<1x256xi1>
    %48 = vector.broadcast %47 : vector<1x256xi1> to vector<4x256xi1>
    %49 = arith.select %48, %45, %46 : vector<4x256xi1>, vector<4x256xf32>
    %c255_i32 = arith.constant 255 : i32
    %50 = tpu.dynamic_rotate %27 by %c255_i32 dim 1 : vector<4x256xf32>, i32 -> vector<4x256xf32>
    %cst_14 = arith.constant 0.000000e+00 : f32
    %51 = vector.broadcast %cst_14 : f32 to vector<4x256xf32>
    %52 = vector.shape_cast %24 : vector<1x256xi1> to vector<1x256xi1>
    %53 = vector.broadcast %52 : vector<1x256xi1> to vector<4x256xi1>
    %54 = arith.select %53, %50, %51 : vector<4x256xi1>, vector<4x256xf32>
    %c241_i32 = arith.constant 241 : i32
    %55 = tpu.dynamic_rotate %27 by %c241_i32 dim 1 : vector<4x256xf32>, i32 -> vector<4x256xf32>
    %56 = arith.andi %20, %22 : vector<1x256xi1>
    %cst_15 = arith.constant 0.000000e+00 : f32
    %57 = vector.broadcast %cst_15 : f32 to vector<4x256xf32>
    %58 = vector.shape_cast %56 : vector<1x256xi1> to vector<1x256xi1>
    %59 = vector.broadcast %58 : vector<1x256xi1> to vector<4x256xi1>
    %60 = arith.select %59, %55, %57 : vector<4x256xi1>, vector<4x256xf32>
    %c240_i32_16 = arith.constant 240 : i32
    %61 = tpu.dynamic_rotate %27 by %c240_i32_16 dim 1 : vector<4x256xf32>, i32 -> vector<4x256xf32>
    %cst_17 = arith.constant 0.000000e+00 : f32
    %62 = vector.broadcast %cst_17 : f32 to vector<4x256xf32>
    %63 = vector.shape_cast %20 : vector<1x256xi1> to vector<1x256xi1>
    %64 = vector.broadcast %63 : vector<1x256xi1> to vector<4x256xi1>
    %65 = arith.select %64, %61, %62 : vector<4x256xi1>, vector<4x256xf32>
    %c239_i32 = arith.constant 239 : i32
    %66 = tpu.dynamic_rotate %27 by %c239_i32 dim 1 : vector<4x256xf32>, i32 -> vector<4x256xf32>
    %67 = arith.andi %20, %24 : vector<1x256xi1>
    %cst_18 = arith.constant 0.000000e+00 : f32
    %68 = vector.broadcast %cst_18 : f32 to vector<4x256xf32>
    %69 = vector.shape_cast %67 : vector<1x256xi1> to vector<1x256xi1>
    %70 = vector.broadcast %69 : vector<1x256xi1> to vector<4x256xi1>
    %71 = arith.select %70, %66, %68 : vector<4x256xi1>, vector<4x256xf32>
    %72 = tpu.concatenate %33, %38, %44, %49, %27, %54, %60, %65, %71 in 0 : vector<4x256xf32>, vector<4x256xf32>, vector<4x256xf32>, vector<4x256xf32>, vector<4x256xf32>, vector<4x256xf32>, vector<4x256xf32>, vector<4x256xf32>, vector<4x256xf32> -> vector<36x256xf32>
    %73 = arith.truncf %72 : vector<36x256xf32> to vector<36x256xbf16>
    %cst_19 = arith.constant dense<0.000000e+00> : vector<16x256xf32>
    %74 = tpu.matmul %25, %73, %cst_19 {dimension_numbers = #tpu.dot_dimension_numbers<[1], [0], [0], [1], [0, 0, 1, 1], [], []>} : vector<16x36xbf16>, vector<36x256xbf16>, vector<16x256xf32> -> vector<16x256xf32>
    %75 = vector.extract_strided_slice %74 {offsets = [0, 0], sizes = [8, 256], strides = [1, 1]} : vector<16x256xf32> to vector<8x256xf32>
    %76 = arith.negf %75 : vector<8x256xf32>
    %77 = math.exp %76 : vector<8x256xf32>
    %cst_20 = arith.constant 1.000000e+00 : f32
    %78 = vector.broadcast %cst_20 : f32 to vector<8x256xf32>
    %79 = arith.addf %78, %77 : vector<8x256xf32>
    %80 = arith.divf %78, %79 : vector<8x256xf32>
    %81 = vector.extract_strided_slice %74 {offsets = [8, 0], sizes = [8, 256], strides = [1, 1]} : vector<16x256xf32> to vector<8x256xf32>
    %82 = arith.mulf %81, %80 : vector<8x256xf32>
    %c0_21 = arith.constant 0 : index
    %c0_22 = arith.constant 0 : index
    %c0_23 = arith.constant 0 : index
    %83 = vector.load %arg3[%c0_21, %c0_22, %c0_23] : memref<1x8x256xf32, #tpu.memory_space<vmem>>, vector<1x8x256xf32>
    %84 = vector.shape_cast %83 : vector<1x8x256xf32> to vector<8x256xf32>
    %85 = vector.shape_cast %82 : vector<8x256xf32> to vector<1x8x256xf32>
    tpu.vector_store %arg3[%c0_21, %c0_22, %c0_23], %85 {strides = array<i32>} : memref<1x8x256xf32, #tpu.memory_space<vmem>>, vector<1x8x256xf32>,
    return
  }
  func.func @transform_0(%arg0: i32) -> (i32, i32, i32) {
    %c0_i32 = arith.constant 0 : i32
    %c0_i32_0 = arith.constant 0 : i32
    %c0_i32_1 = arith.constant 0 : i32
    return %arg0, %c0_i32, %c0_i32_0 : i32, i32, i32
  }
  func.func @transform_1(%arg0: i32) -> (i32, i32) {
    %c0_i32 = arith.constant 0 : i32
    %c0_i32_0 = arith.constant 0 : i32
    %c0_i32_1 = arith.constant 0 : i32
    return %c0_i32, %c0_i32_0 : i32, i32
  }
  func.func @transform_2(%arg0: i32) -> (i32, i32, i32) {
    %c0_i32 = arith.constant 0 : i32
    %c0_i32_0 = arith.constant 0 : i32
    %c0_i32_1 = arith.constant 0 : i32
    return %arg0, %c0_i32, %c0_i32_0 : i32, i32, i32
  }
}

</mosaic_0001>

<bundles_post_ra>
// kernel: tpu_custom_call.1
= control target key start
LH: loop header
LB: loop body
LE: loop exit
PB: predicated region body
PF: predicated region fallthrough
CT: control target
= control target key end

     0   :  { %7 = vsyncpa [#allocation3], 0  ;;  %s1172_s0 = inlined_call_operand.hbm [shape: f32[2,4,256], index: 0, kind: input, shape index: {}]   ;;  %s1173_s1 = inlined_call_operand.hbm [shape: bf16[16,36], index: 1, kind: input, shape index: {}]   ;;  %s1174_s2 = inlined_call_operand.hbm [shape: f32[2,8,256], index: 2, kind: output, shape index: {}]  }
   0x1   :  { %9 = vsyncpa [#allocation3 + $0x1], 0 }
   0x2   :  { %10 = vsyncpa [#allocation6], 0 }
   0x3   :  { %11 = vsyncpa [#allocation4], 0 }
   0x4   :  { %13 = vsyncpa [#allocation4 + $0x1], 0  ;;  %s838_s9 = smov 0   ;;  %s840_s10 = smov 0  }
   0x5   :  { %s842_s11 = smov 0   ;;  %s844_s12 = smov 0  }
   0x6 LB: > { %s859_s13 = sadd.s32 4294967295, %s807_s12   ;;  %s538_s14 = sadd.s32 4294967294, %s807_s12   ;;  %s807_s12 = sphi %s844_s12, %s1208_s12   ;;  %s803_s11 = sphi %s842_s11, %s1207_s11   ;;  %s799_s10 = sphi %s840_s10, %s1206_s10   ;;  %s795_s9 = sphi %s838_s9, %s1205_s9  }
   0x7   : > { %p39_p0 = scmp.ne.s32.totalorder %s799_s10, %s795_s9  ;;  %p1175_p1 = scmp.eq.s32.totalorder %s859_s13, 0 }
   0x8   : > { %p90_p3 = scmp.eq.s32.totalorder %s538_s14, 1  ;;  %p539_p5 = scmp.ge.s32.totalorder %s807_s12, 1 }
   0x9   : > { %p868_p4 = por %p1175_p1, %p39_p0  ;;  %p97_p7 = scmp.lt.s32.totalorder %s807_s12, 3 }
   0xa   : > { %p873_p6 = por %p90_p3, %p39_p0  ;;  %s809_s18 = smov [#allocation5]  }
   0xb   : > { %s1178_s15 = scalar_select %p868_p4, 1, 0 }
   0xc   : > { %s1179_s16 = scalar_select %p873_p6, 1, 0 }
   0xd   : > { %p878_p8 = pnand %p539_p5, %p97_p7  ;;  %s109_s19 = sshll.u32 %s809_s18, 4  ;;  %s882_s19 = int_to_ptr.vmem [resolvable:$true] %s109_s19 }
   0xe   : > { %s894_s21 = sadd.s32 1, %s807_s12   ;;  %s26_s22 = sadd.s32 1, %s803_s11 }
   0xf   : > { %s1180_s17 = scalar_select %p878_p8, 1, 0 }
  0x10   : > { %p569_p9 = pneg %p878_p8  ;;  %s23_s23 = ssub.s32 %s807_s12, %s894_s21 }
  0x11   : > { %s679_s26 = scalar_lea.hbm %s1173_s1, 128 }
  0x12   : > { %p889_p11 = pnand %p569_p9, %p1175_p1  ;;  %p680_p12 = scmp.ne.s32.totalorder %s1173_s1, %s679_s26 }
  0x13   : > { %p686_p5 = scmp.lt.u32.totalorder %s679_s26, %s1173_s1 }
  0x14   : > { %p681_p13 = pneg %p889_p11 }
  0x16   : > { %p682_p0 = pnand %p681_p13, %p680_p12 }
  0x18   : > { %p683_p3 = pneg %p682_p0 }
  0x1a   : > { %p688_p7 = pnand %p686_p5, %p683_p3 }
  0x1c   : > { %691 = shalt.err (!%p688_p7)
}
  0x1d   : > { %s692_s3 = scalar_lea.vmem %s882_s19, 128  ;;  %p700_p2 = scmp.lt.s32.totalorder %s882_s19, %s882_s19 }
  0x1e   : > { %p693_p9 = scmp.ne.s32.totalorder %s882_s19, %s692_s3  ;;  %p701_p6 = scmp.lt.s32.totalorder %s692_s3, %s692_s3 }
  0x20   : > { %p695_p10 = pnand %p693_p9, %p681_p13  ;;  %p702_p4 = por %p701_p6, %p700_p2 }
  0x22   : > { %p696_p1 = pneg %p695_p10 }
  0x24   : > { %p703_p8 = pnand %p702_p4, %p696_p1 }
  0x26   : > { %706 = shalt.err (!%p703_p8)
}
  0x27   : > { %s810_s4 = smov 64   ;;  %s811_s5 = smov 4  }
  0x28   : > { %572 = dma.hbm_to_vmem [thread:$0]  (!%p889_p11), %s1173_s1, 128, %s882_s19, [#allocation6], %s810_s4, %s810_s4, %s811_s5  }
  0x29   : > { %p24_p2 = scmp.eq.s32.totalorder %s23_s23, 0  ;;  %p33_p1 = scmp.ne.s32.totalorder %s803_s11, %s799_s10 }
  0x2a   : > { %p34_p4 = scmp.eq.s32.totalorder %s807_s12, 0  ;;  %p582_p6 = scmp.lt.s32.totalorder %s807_s12, 2 }
  0x2b   : > { %s925_s8 = scalar_select %p24_p2, %s803_s11, %s26_s22  }
  0x2c   : > { %p35_p8 = por %p34_p4, %p33_p1  ;;  %p1182_p10 = scmp.eq.s32.totalorder %s859_s13, 1 }
  0x2d   : > { %s123_s18 = sand.u32 1, %s803_s11   ;;  %s559_s24 = sshll.u32 %s807_s12, 7 }
  0x2e   : > { %p929_p12 = por %p1182_p10, %p33_p1  ;;  %s542_s25 = sshll.u32 %s123_s18, 3 }
  0x2f   : > { %s938_s27 = scalar_lea.hbm %s1172_s0, %s559_s24  ;;  %s127_s19 = scalar_lea.vmem [#allocation2], %s542_s25 }
  0x30   : > { %s135_s22 = sshll.u32 %s127_s19, 4  ;;  %p940_p11 = pnand %p582_p6, %p35_p8  ;;  %s944_s22 = int_to_ptr.vmem [resolvable:$true] %s135_s22 }
  0x31   : > { %s124_s28 = scalar_lea.sflag [#allocation3], %s123_s18  ;;  %s707_s29 = scalar_lea.hbm %s938_s27, 128 }
  0x32   : > { %p708_p13 = scmp.ne.s32.totalorder %s938_s27, %s707_s29  ;;  %p709_p0 = pneg %p940_p11 }
  0x33   : > { %s712_s4 = scalar_lea.hbm %s1172_s0, 256  ;;  %p713_p7 = scmp.lt.u32.totalorder %s938_s27, %s1172_s0 }
  0x34   : > { %p710_p3 = pnand %p709_p0, %p708_p13  ;;  %p714_p9 = scmp.lt.u32.totalorder %s712_s4, %s707_s29 }
  0x35   : > { %p716_p1 = scmp.lt.u32.totalorder %s707_s29, %s938_s27 }
  0x36   : > { %p711_p5 = pneg %p710_p3  ;;  %p715_p2 = por %p714_p9, %p713_p7 }
  0x38   : > { %p717_p4 = por %p716_p1, %p715_p2 }
  0x3a   : > { %p718_p6 = pnand %p717_p4, %p711_p5 }
  0x3c   : > { %721 = shalt.err (!%p718_p6)
}
  0x3d   : > { %s722_s7 = scalar_lea.vmem %s944_s22, 128  ;;  %s812_s18 = smov [#allocation2]  }
  0x3e   : > { %p723_p8 = scmp.ne.s32.totalorder %s944_s22, %s722_s7  ;;  %s727_s24 = sshll.u32 %s812_s18, 4  ;;  %s728_s24 = int_to_ptr.vmem [resolvable:$false] %s727_s24 }
  0x3f   : > { %s729_s25 = scalar_lea.vmem %s728_s24, 256  ;;  %p730_p3 = scmp.lt.s32.totalorder %s944_s22, %s728_s24 }
  0x40   : > { %p725_p10 = pnand %p723_p8, %p709_p0  ;;  %p731_p7 = scmp.lt.s32.totalorder %s729_s25, %s722_s7 }
  0x42   : > { %p726_p13 = pneg %p725_p10  ;;  %p732_p9 = por %p731_p7, %p730_p3 }
  0x44   : > { %p733_p2 = pnand %p732_p9, %p726_p13 }
  0x46   : > { %736 = shalt.err (!%p733_p2)
}
  0x47   : > { %576 = dma.hbm_to_vmem [thread:$0]  (!%p940_p11), %s938_s27, 128, %s944_s22, %s124_s28  }
  0x48   : > { %p1185_p5 = scmp.ne.s32.totalorder %s1180_s17, 0 }
  0x49   : > { %s974_s20 = sand.u32 (!%p1185_p5), 1, %s799_s10   ;;  %p1186_p0 = scmp.ne.s32.totalorder (!%p1185_p5), %s1178_s15, 0 }
  0x4a   : > { %144 = sbr.rel (%p1185_p5) target bundleno = 487 (0x1e7), region = 28  ;;  %s546_s26 = sshll.u32 (!%p1185_p5), %s974_s20, 3 }
  0x4b   : > { %s147_s19 = scalar_lea.sflag (!%p1185_p5), [#allocation3], %s974_s20  ;;  %s150_s29 = scalar_lea.vmem (!%p1185_p5), [#allocation2], %s546_s26 }
  0x51   : > { %782 = dma.done.wait (%p1186_p0), %s147_s19, 128  }
  0x52   : > { %784 = vsyncadd (%p1186_p0), %s147_s19, 4294967168  ;;  %p1187_p1 = scmp.eq.s32.totalorder %s859_s13, 0 }
  0x54   : > { %786 = dma.done.wait (%p1187_p1), [#allocation6], 128   ;;  %p1188_p11 = pmov %p1187_p1 }
  0x55   : > { %v986_v0 = vld [vmem:[%s150_s29] sm:$0xff]  ;;  %s813_s17 = smov 17   ;;  %s814_s27 = smov 1   ;;  %v821_v3 = vmov 0   ;;  %v176_v4 = vlaneseq  ;;  %vm353_vm11 = vcmask 1043456  }
  0x56   : > { %788 = vsyncadd (%p1188_p11), [#allocation6], 4294967168  ;;  %v990_v1 = vcombine.high %v986_v0, %v986_v0  ;;  %s815_s15 = smov 15   ;;  %s816_s22 = smov 16   ;;  %416 = vmatprep.mubr.bf16.mxu0 %v821_v3 }
  0x57   : > { %s817_s23 = smov 127   ;;  %s818_s28 = smov 112   ;;  %v994_v5 = vand.u32 127, %v176_v4 }
  0x58   : > { %v639_v2 = vpack.i.bf16 %v990_v1, %v986_v0  ;;  %s819_s30 = smov 113   ;;  %s820_s3 = smov 111  }
  0x59   : > { %v997_v6 = vadd.s32 128, %v994_v5  ;;  %v183_v7 = vand.u32 15, %v994_v5  ;;  %vm264_vm0 = vcmp.lt.s32.totalorder %v994_v5, 1  ;;  %vm236_vm1 = vcmp.lt.s32.totalorder %v994_v5, 16  ;;  %s548_s4 = sshll.u32 %s974_s20, 4  ;;  %s560_s5 = sshll.u32 %s859_s13, 8 }
  0x5a   : > { %640 = vrot.lane.b32.xlu1 %v639_v2, %s813_s17  ;;  %630 = vrot.lane.b32.xlu0 %v639_v2, %s814_s27  ;;  %vm221_vm2 = vcmp.lt.s32.totalorder %v994_v5, 17  ;;  %vm277_vm3 = vcmp.lt.s32.totalorder %v994_v5, 127  ;;  %vm249_vm6 = vcmp.lt.s32.totalorder %v994_v5, 15  ;;  %vm203_vm7 = vcmp.ge.s32.totalorder %v994_v5, 16  ;;  %s174_s6 = scalar_lea.vmem [#allocation7], %s548_s4  ;;  %s1128_s25 = scalar_lea.hbm %s1174_s2, %s560_s5 }
  0x5b   : > { %v190_v8 = vand.u32 15, %v997_v6  ;;  %vm1005_vm4 = vcmp.ge.s32.totalorder %v183_v7, 1  ;;  %vm1015_vm8 = vcmp.le.s32.totalorder %v183_v7, 14  ;;  %vm206_vm9 = vcmp.lt.s32.totalorder %v997_v6, 240  ;;  %s458_s7 = sshll.u32 %s174_s6, 4  ;;  %s444_s26 = scalar_lea.sflag [#allocation4], %s974_s20  ;;  %s1130_s7 = int_to_ptr.vmem [resolvable:$true] %s458_s7 }
  0x5c   : > { %vm1036_vm12 = vmand %vm203_vm7, %vm1005_vm4  ;;  %vm305_vm13 = vcmp.lt.s32.totalorder %v994_v5, 112  ;;  %vm290_vm14 = vcmp.lt.s32.totalorder %v994_v5, 113  ;;  %s737_s13 = scalar_lea.vmem %s1130_s7, 256  ;;  %s822_s19 = smov [#allocation7]  }
  0x5d   : > { %vm1009_vm5 = vcmp.ge.s32.totalorder %v190_v8, 1  ;;  %vm1020_vm10 = vcmp.le.s32.totalorder %v190_v8, 14  ;;  %vm1050_vm15 = vmand %vm203_vm7, %vm1015_vm8  ;;  %p738_p4 = scmp.ne.s32.totalorder %s1130_s7, %s737_s13  ;;  %s741_s29 = sshll.u32 %s822_s19, 4  ;;  %s742_s29 = int_to_ptr.vmem [resolvable:$false] %s741_s29 }
  0x5e   : > { %645 = vrot.lane.b32.xlu1 %v639_v2, %s815_s15  ;;  %635 = vrot.lane.b32.xlu0 %v639_v2, %s816_s22  ;;  %s743_s17 = scalar_lea.vmem %s742_s29, 512  ;;  %p744_p10 = scmp.lt.s32.totalorder %s1130_s7, %s742_s29 }
  0x5f   : > { %p739_p6 = pnand %p738_p4, %p929_p12  ;;  %p745_p13 = scmp.lt.s32.totalorder %s743_s17, %s737_s13 }
  0x61   : > { %p740_p8 = pneg %p739_p6  ;;  %p746_p3 = por %p745_p13, %p744_p10 }
  0x62   : > { %650 = vrot.lane.b32.xlu0 %v639_v2, %s817_s23  ;;  %655 = vrot.lane.b32.xlu1 %v639_v2, %s818_s28 }
  0x63   : > { %p747_p7 = pnand %p746_p3, %p740_p8 }
  0x66   : > { %660 = vrot.lane.b32.xlu0 %v639_v2, %s819_s30  ;;  %665 = vrot.lane.b32.xlu1 %v639_v2, %s820_s3 }
  0xcc   : > { %v641_v9 = vpop.permute.xlu1 %640  ;;  %v631_v10 = vpop.permute.xlu0 %630 }
  0xcd   : > { %v643_v13 = vunpack.i.h.bf16 %v641_v9  ;;  %v642_v14 = vunpack.i.l.bf16 %v641_v9  ;;  %v633_v15 = vunpack.i.h.bf16 %v631_v10  ;;  %v632_v16 = vunpack.i.l.bf16 %v631_v10 }
  0xcf   : > { %v265_v19 = vsel %vm264_vm0, %v632_v16, %v633_v15  ;;  %v266_v20 = vsel %vm264_vm0, %v633_v15, %v632_v16  ;;  %v222_v21 = vsel %vm221_vm2, %v642_v14, %v643_v13  ;;  %v223_v22 = vsel %vm221_vm2, %v643_v13, %v642_v14  ;;  %vm322_vm2 = vmand %vm206_vm9, %vm1020_vm10 }
  0xd0   : > { %v646_v24 = vpop.permute.xlu1 %645  ;;  %v636_v25 = vpop.permute.xlu0 %635  ;;  %v272_v26 = vsel %vm1009_vm5, %v265_v19, 0.0  ;;  %v271_v27 = vsel %vm1005_vm4, %v266_v20, 0.0  ;;  %v231_v33 = vsel %vm1009_vm5, %v222_v21, 0.0  ;;  %v230_v35 = vsel %vm1036_vm12, %v223_v22, 0.0 }
  0xd1   : > { %v648_v28 = vunpack.i.h.bf16 %v646_v24  ;;  %v647_v29 = vunpack.i.l.bf16 %v646_v24  ;;  %v638_v30 = vunpack.i.h.bf16 %v636_v25  ;;  %v637_v31 = vunpack.i.l.bf16 %v636_v25 }
  0xd2   : > { %v338_v34 = vrot.slane %v272_v26, 4  ;;  %v337_v36 = vrot.slane %v271_v27, 4  ;;  %vm318_vm0 = vcmp.lt.s32.totalorder %v994_v5, 111 }
  0xd3   : > { %v238_v37 = vsel %vm236_vm1, %v638_v30, %v637_v31  ;;  %v237_v38 = vsel %vm236_vm1, %v637_v31, %v638_v30  ;;  %v250_v39 = vsel %vm249_vm6, %v647_v29, %v648_v28  ;;  %v251_v40 = vsel %vm249_vm6, %v648_v28, %v647_v29  ;;  %vm1094_vm1 = vmand %vm206_vm9, %vm1009_vm5  ;;  %v670_v31 = vld [vmem:[#allocation5] sm:$0xff]  }
  0xd4   : > { %v651_v41 = vpop.permute.xlu0 %650  ;;  %v656_v42 = vpop.permute.xlu1 %655  ;;  %v259_v43 = vsel %vm1020_vm10, %v250_v39, 0.0  ;;  %v332_v44 = vrot.slane %v237_v38, 4  ;;  %v243_v45 = vsel %vm203_vm7, %v238_v37, 0.0  ;;  %v258_v46 = vsel %vm1050_vm15, %v251_v40, 0.0 }
  0xd5   : > { %v653_v47 = vunpack.i.h.bf16 %v651_v41  ;;  %v652_v48 = vunpack.i.l.bf16 %v651_v41  ;;  %v658_v49 = vunpack.i.h.bf16 %v656_v42  ;;  %v657_v50 = vunpack.i.l.bf16 %v656_v42 }
  0xd6   : > { %v355_v51 = vsel %vm353_vm11, %v231_v33, %v332_v44  ;;  %v357_v52 = vsel %vm353_vm11, %v259_v43, %v338_v34  ;;  %v331_v53 = vrot.slane %v243_v45, 4  ;;  %v356_v54 = vsel %vm353_vm11, %v258_v46, %v337_v36 }
  0xd7   : > { %v278_v55 = vsel %vm277_vm3, %v652_v48, %v653_v47  ;;  %v279_v56 = vsel %vm277_vm3, %v653_v47, %v652_v48  ;;  %v306_v57 = vsel %vm305_vm13, %v657_v50, %v658_v49  ;;  %v307_v58 = vsel %vm305_vm13, %v658_v49, %v657_v50 }
  0xd8   : > { %v284_v59 = vsel %vm1015_vm8, %v278_v55, 0.0  ;;  %v313_v60 = vsel %vm206_vm9, %v307_v58, 0.0  ;;  %v349_v61 = vrot.slane %v306_v57, 4  ;;  %v661_v62 = vpop.permute.xlu0 %660  ;;  %v285_v63 = vsel %vm1020_vm10, %v279_v56, 0.0  ;;  %v666_v2 = vpop.permute.xlu1 %665 }
  0xd9   : > { %v343_v3 = vrot.slane %v284_v59, 4  ;;  %v350_v4 = vrot.slane %v313_v60, 4  ;;  %v663_v7 = vunpack.i.h.bf16 %v661_v62  ;;  %v662_v8 = vunpack.i.l.bf16 %v661_v62 }
  0xda   : > { %v344_v10 = vrot.slane %v285_v63, 4  ;;  %v363_v13 = vpack.c.bf16 %v357_v52, %v355_v51  ;;  %v354_v14 = vsel %vm353_vm11, %v230_v35, %v331_v53  ;;  %v668_v15 = vunpack.i.h.bf16 %v666_v2 }
  0xdb   : > { %v291_v16 = vsel %vm290_vm14, %v662_v8, %v663_v7  ;;  %v292_v19 = vsel %vm290_vm14, %v663_v7, %v662_v8  ;;  %v362_v20 = vpack.c.bf16 %v356_v54, %v354_v14  ;;  %v667_v12 = vunpack.i.l.bf16 %v666_v2 }
  0xdc   : > { %v299_v21 = vsel %vm1005_vm4, %v291_v16, 0.0  ;;  %384 = vmatprep.subr.bf16.mxu0 %v363_v13  ;;  %v300_v22 = vsel %vm1094_vm1, %v292_v19, 0.0  ;;  %v359_v23 = vsel %vm353_vm11, %v990_v1, %v344_v10  ;;  %v358_v24 = vsel %vm353_vm11, %v986_v0, %v343_v3 }
  0xdd   : > { %385 = vmatpush1.bf16.msra.mxu0 %v362_v20  ;;  %v320_v18 = vsel %vm318_vm0, %v668_v15, %v667_v12  ;;  %v361_v6 = vsel %vm353_vm11, %v300_v22, %v350_v4  ;;  %v360_v25 = vsel %vm353_vm11, %v299_v21, %v349_v61  ;;  %v319_v11 = vsel %vm318_vm0, %v667_v12, %v668_v15 }
  0xde   : > { %v328_v26 = vsel %vm322_vm2, %v320_v18, 0.0  ;;  %v365_v27 = vpack.c.bf16 %v361_v6, %v359_v23  ;;  %v364_v28 = vpack.c.bf16 %v360_v25, %v358_v24  ;;  %v327_v1 = vsel %vm1015_vm8, %v319_v11, 0.0 }
  0xdf   : > { %v367_v29 = vpack.c.bf16 %v328_v26, %v328_v26  ;;  %vm377_vm3 = vcmask 1041408   ;;  %v366_v0 = vpack.c.bf16 %v327_v1, %v327_v1  ;;  %vm373_vm4 = vcmask 293888  }
  0xe0   : > { %386 = vmatprep.subr.bf16.mxu0 %v365_v27 }
  0xe1   : > { %387 = vmatpush1.bf16.msra.mxu0 %v364_v28  ;;  %v379_v30 = vsel %vm377_vm3, %v366_v0, 0 }
  0xe2   : > { %550 = vmatprep.subr.msk.bf16.mxu0 %vm377_vm3, %v367_v29 }
  0xe5   : > { %389 = vmatpush1.bf16.msra.mxu0 %v379_v30 }
  0xe8   : > { %551 = vmatmul.mubr.msk.bf16.vlgmr.msra.gmra.mrb[0].mxu0 %vm373_vm4, %v670_v31 }
 0x1bb   : > { %v418_v5 = vpop.f32.mrb[0].mxu0 }
 0x1bc   : > { %v552_v32 = vmul.f32 -1.442695, %v418_v5  ;;  %v420_v33 = vpop.f32.mrb[1].mxu0 }
 0x1bd   : > { %v553_v34 = vmul.f32 -1.442695, %v420_v33  ;;  %v422_v35 = vpop.f32.mrb[2].mxu0 }
 0x1be   : > { %671 = vpow2.f32 %v552_v32  ;;  %v424_v17 = vpop.f32.mrb[3].mxu0 }
 0x1bf   : > { %673 = vpow2.f32 %v553_v34 }
 0x1c8   : > { %v672_v36 = vpop.eup %671 }
 0x1c9   : > { %v674_v37 = vpop.eup %673  ;;  %v433_v38 = vadd.f32 1.0, %v672_v36 }
 0x1ca   : > { %v434_v39 = vadd.f32 1.0, %v674_v37 }
 0x1cb   : > { %675 = vrcp.f32 %v433_v38 }
 0x1cc   : > { %677 = vrcp.f32 %v434_v39 }
 0x1d5   : > { %v676_v40 = vpop.eup %675 }
 0x1d6   : > { %v678_v41 = vpop.eup %677  ;;  %v439_v42 = vmul.f32 %v676_v40, %v422_v35 }
 0x1d7   : > { %v440_v43 = vmul.f32 %v678_v41, %v424_v17 }
 0x1d8   : > { %441 = vst [vmem:[%s174_s6] sm:$0xff] %v439_v42 }
 0x1d9   : > { %442 = vst [vmem:[%s174_s6 + $0x8] sm:$0xff] %v440_v43 }
 0x1da   : > { %750 = shalt.err (!%p747_p7)
}
 0x1db   : > { %s751_s20 = scalar_lea.hbm %s1128_s25, 256  ;;  %s755_s22 = scalar_lea.hbm %s1174_s2, 512 }
 0x1dc   : > { %p752_p9 = scmp.ne.s32.totalorder %s1128_s25, %s751_s20  ;;  %p756_p0 = scmp.lt.u32.totalorder %s1128_s25, %s1174_s2 }
 0x1dd   : > { %p757_p1 = scmp.lt.u32.totalorder %s755_s22, %s751_s20  ;;  %p759_p4 = scmp.lt.u32.totalorder %s751_s20, %s1128_s25 }
 0x1de   : > { %p753_p2 = pnand %p752_p9, %p929_p12 }
 0x1df   : > { %p758_p11 = por %p757_p1, %p756_p0 }
 0x1e0   : > { %p754_p5 = pneg %p753_p2 }
 0x1e1   : > { %p760_p6 = por %p759_p4, %p758_p11 }
 0x1e3   : > { %p761_p8 = pnand %p760_p6, %p754_p5 }
 0x1e5   : > { %764 = shalt.err (!%p761_p8)
}
 0x1e6   : > { %567 = dma.vmem_to_hbm [thread:$0]  (%p929_p12), %s1130_s7, 256, %s1128_s25, %s444_s26  }
 0x1e7 PF: > { %s470_s30 = sand.u32 1, %s795_s9   ;;  %p1203_p10 = scmp.ne.s32.totalorder %s1179_s16, 0 }
 0x1e8   : > { %p1204_p13 = scmp.ge.s32.totalorder %s807_s12, 2  ;;  %s471_s3 = scalar_lea.sflag [#allocation4], %s470_s30 }
 0x1ea   : > { %p578_p3 = pnand %p1204_p13, %p1203_p10 }
 0x1ec   : > { %790 = dma.done.wait (!%p578_p3), %s471_s3, 256  }
 0x1ed   : > { %792 = vsyncadd (!%p578_p3), %s471_s3, 4294967040  ;;  %p16_p7 = scmp.ge.s32.totalorder %s894_s21, 4   ;;  %s1205_s9 = smov %s799_s10 }
 0x1ee   : > { %s1206_s10 = smov %s803_s11  ;;  %s1207_s11 = smov %s925_s8 }
 0x1ef   : > { %s1208_s12 = smov %s894_s21  ;;  %18 = sbr.rel (!%p16_p7) target bundleno = 6 (0x6), region = 77 }
 0x1f6   :  { %476 = vsyncpa [#allocation3], 1 }
 0x1f7   :  { %478 = vsyncpa [#allocation3 + $0x1], 1 }
 0x1f8   :  { %479 = vsyncpa [#allocation6], 1 }
 0x1f9   :  { %480 = vsyncpa [#allocation4], 1 }
 0x1fa   :  { %482 = vsyncpa [#allocation4 + $0x1], 1 }

</bundles_post_ra>
